<compile_context>
chip_gen: v7x
topology: tpu7x:2x2x1
jax: 0.10.0
libtpu: 0.0.40
codegen_flags: <defaults>
</compile_context>

<pallas_src>
import functools

import jax
import jax.numpy as jnp
from jax.experimental import pallas as pl
from jax.experimental.pallas import tpu as pltpu

_LANES = 128
_MAX_TILE_ROWS = 2048        # 2048 x 128 x 4B = 1 MiB per f32 buffer
_XLA_FALLBACK_ELEMS = 4096   # below this, launch overhead dwarfs the work


def _sublane_multiple(dtype):
    # second-minor tiling multiple: 8 for 32-bit, 16 for 16-bit, 32 for 8-bit
    return max(8, 32 // jnp.dtype(dtype).itemsize)


def _noop_bounds(dtype):
    """Sentinels that make max()/min() a no-op for coords they don't clamp."""
    if jnp.issubdtype(dtype, jnp.floating):
        return float("-inf"), float("inf")
    info = jnp.iinfo(dtype)
    return int(info.min), int(info.max)


def _clip_boxes_kernel(x_ref, o_ref, *, width, height, lo_fill, hi_fill):
    """Clamp a lane-dense (tile_rows, 128) block. Pure VPU, 2 ops / data vreg."""
    dt = x_ref.dtype
    # Coordinate index (0..3) repeats purely along lanes since 128 % 4 == 0;
    # build (1, 128) lo/hi vectors once and let broadcasting cover sublanes.
    coord = jax.lax.broadcasted_iota(jnp.int32, (1, _LANES), 1) & 3
    is_min = coord < 2
    lo = jnp.where(is_min, jnp.asarray(0, dt), jnp.asarray(lo_fill, dt))
    hi = jnp.where(is_min, jnp.asarray(hi_fill, dt),
                   jnp.where(coord == 2, jnp.asarray(width, dt),
                             jnp.asarray(height, dt)))
    o_ref[...] = jnp.minimum(jnp.maximum(x_ref[...], lo), hi)


def _clip_xla(boxes, width, height):
    """Fused single-pass XLA clamp (tiny or 128-unaligned inputs)."""
    dt = boxes.dtype
    coord = jnp.arange(4)
    hi = jnp.where(coord == 2, width, height).astype(dt)
    return jnp.where(coord < 2,
                     jnp.maximum(boxes, jnp.asarray(0, dt)),
                     jnp.minimum(boxes, hi))


def _pick_tile_rows(rows, sub):
    """Tile rows: <= ~1 MiB blocks, multiple of `sub`, even grid length >= 2."""
    cap = max(sub, (_MAX_TILE_ROWS // sub) * sub)
    steps = max(2, pl.cdiv(rows, cap))
    if steps % 2:
        steps += 1                     # balanced split across v7x's two cores
    tile = pl.cdiv(rows, steps)
    tile = ((tile + sub - 1) // sub) * sub
    return max(sub, min(cap, tile))


@jax.jit
def clip_boxes(boxes, img):
    """Pallas implementation of ClipBoxes.forward(boxes, img)."""
    height, width = img.shape[2], img.shape[3]   # static (trace-time) ints
    B, N, four = boxes.shape
    assert four == 4

    total = B * N * 4
    rows = total // _LANES
    sub = _sublane_multiple(boxes.dtype)

    # Tiny or 128-unaligned inputs: a fused XLA clamp is already one HBM read
    # + one write; a Pallas launch (or wrapper-side pad/slice passes) would
    # only add overhead there.
    if total < _XLA_FALLBACK_ELEMS or total % _LANES != 0 or rows < sub:
        return _clip_xla(boxes, width, height)

    # Lane-dense, copy-free view: (B, N, 4) -> (rows, 128) is a pure bitcast.
    x2d = boxes.reshape(rows, _LANES)
    tile_rows = _pick_tile_rows(rows, sub)
    lo_fill, hi_fill = _noop_bounds(boxes.dtype)

    kernel = functools.partial(_clip_boxes_kernel, width=width, height=height,
                               lo_fill=lo_fill, hi_fill=hi_fill)

    out2d = pl.pallas_call(
        kernel,
        out_shape=jax.ShapeDtypeStruct((rows, _LANES), boxes.dtype),
        grid=(pl.cdiv(rows, tile_rows),),        # ragged last tile is masked
        in_specs=[pl.BlockSpec((tile_rows, _LANES), lambda i: (i, 0))],
        out_specs=pl.BlockSpec((tile_rows, _LANES), lambda i: (i, 0)),
        compiler_params=pltpu.CompilerParams(
            dimension_semantics=("parallel",),
        ),
    )(x2d)

    return out2d.reshape(B, N, 4)


def _reference(boxes, img):
    height, width = img.shape[2], img.shape[3]
    ref = boxes
    ref = ref.at[:, :, 0].set(jnp.maximum(ref[:, :, 0], 0.0))
    ref = ref.at[:, :, 1].set(jnp.maximum(ref[:, :, 1], 0.0))
    ref = ref.at[:, :, 2].set(jnp.minimum(ref[:, :, 2], float(width)))
    ref = ref.at[:, :, 3].set(jnp.minimum(ref[:, :, 3], float(height)))
    return ref


if __name__ == "__main__":
    key = jax.random.PRNGKey(0)
    k1, k2, k3, k4 = jax.random.split(key, 4)

    # 1) Pallas path, fully aligned: rows=256 -> two 128-row tiles (even grid).
    B, N = 2, 4096
    C, H, W = 4, 16, 16
    boxes = jax.random.normal(k1, (B, N, 4), dtype=jnp.float32) * 20.0
    img = jnp.zeros((B, C, H, W), dtype=jnp.float32)
    out = jax.block_until_ready(clip_boxes(boxes, img))
    assert out.shape == boxes.shape and out.dtype == boxes.dtype
    assert jnp.allclose(out, _reference(boxes, img)), "aligned case mismatch"

    # 2) Pallas path with a masked (partial) last tile: rows=2500, tile=1256.
    boxes2 = jax.random.normal(k2, (2, 40000, 4), dtype=jnp.float32) * 40.0
    img2 = jnp.zeros((1, 3, 24, 32), dtype=jnp.float32)      # H=24, W=32
    out2 = jax.block_until_ready(clip_boxes(boxes2, img2))
    assert jnp.allclose(out2, _reference(boxes2, img2)), "masked-tile mismatch"

    # 3) Tiny toy shape (module-typical): fused-XLA fallback path.
    boxes3 = jax.random.normal(k3, (2, 8, 4), dtype=jnp.float32) * 20.0
    img3 = jnp.zeros((2, 4, 16, 16), dtype=jnp.float32)
    out3 = jax.block_until_ready(clip_boxes(boxes3, img3))
    assert jnp.allclose(out3, _reference(boxes3, img3)), "tiny case mismatch"

    # 4) 128-unaligned total (B*N % 32 != 0): fused-XLA fallback path.
    boxes4 = jax.random.normal(k4, (2, 1001, 4), dtype=jnp.float32) * 30.0
    img4 = jnp.zeros((1, 3, 20, 28), dtype=jnp.float32)
    out4 = jax.block_until_ready(clip_boxes(boxes4, img4))
    assert jnp.allclose(out4, _reference(boxes4, img4)), "ragged case mismatch"

    print("KERNEL_OK")
</pallas_src>

<mosaic_0001>
module attributes {stable_mosaic.version = 11 : i64} {
  func.func @_clip_boxes_kernel(%arg0: i32, %arg1: memref<128x128xf32, #tpu.memory_space<vmem>>, %arg2: memref<128x128xf32, #tpu.memory_space<vmem>>) attributes {dimension_semantics = [#tpu.dimension_semantics<parallel>], iteration_bounds = array<i64: 2>, scalar_prefetch = 0 : i64, scratch_operands = 0 : i64, tpu.core_type = #tpu.core_type<tc>, window_params = [{transform_indices = @transform_0, window_bounds = array<i64: 128, 128>}, {transform_indices = @transform_1, window_bounds = array<i64: 128, 128>}]} {
    %0 = tpu.iota {dimensions = array<i32: 1>} : vector<1x128xi32>
    %c3_i32 = arith.constant 3 : i32
    %1 = vector.broadcast %c3_i32 : i32 to vector<1x128xi32>
    %2 = arith.andi %0, %1 : vector<1x128xi32>
    %c2_i32 = arith.constant 2 : i32
    %3 = vector.broadcast %c2_i32 : i32 to vector<1x128xi32>
    %4 = arith.cmpi slt, %2, %3 : vector<1x128xi32>
    %cst = arith.constant 0.000000e+00 : f32
    %cst_0 = arith.constant 0xFF800000 : f32
    %5 = vector.broadcast %cst : f32 to vector<1x128xf32>
    %6 = vector.broadcast %cst_0 : f32 to vector<1x128xf32>
    %7 = arith.select %4, %5, %6 : vector<1x128xi1>, vector<1x128xf32>
    %c2_i32_1 = arith.constant 2 : i32
    %8 = vector.broadcast %c2_i32_1 : i32 to vector<1x128xi32>
    %9 = arith.cmpi eq, %2, %8 : vector<1x128xi32>
    %cst_2 = arith.constant 1.600000e+01 : f32
    %cst_3 = arith.constant 1.600000e+01 : f32
    %10 = vector.broadcast %cst_2 : f32 to vector<1x128xf32>
    %11 = vector.broadcast %cst_3 : f32 to vector<1x128xf32>
    %12 = arith.select %9, %10, %11 : vector<1x128xi1>, vector<1x128xf32>
    %cst_4 = arith.constant 0x7F800000 : f32
    %13 = vector.broadcast %cst_4 : f32 to vector<1x128xf32>
    %14 = arith.select %4, %13, %12 : vector<1x128xi1>, vector<1x128xf32>
    %c0 = arith.constant 0 : index
    %c0_5 = arith.constant 0 : index
    %15 = vector.load %arg1[%c0, %c0_5] : memref<128x128xf32, #tpu.memory_space<vmem>>, vector<128x128xf32>
    %16 = vector.broadcast %7 : vector<1x128xf32> to vector<128x128xf32>
    %17 = arith.maximumf %15, %16 : vector<128x128xf32>
    %18 = vector.broadcast %14 : vector<1x128xf32> to vector<128x128xf32>
    %19 = arith.minimumf %17, %18 : vector<128x128xf32>
    %c0_6 = arith.constant 0 : index
    %c0_7 = arith.constant 0 : index
    %20 = vector.load %arg2[%c0_6, %c0_7] : memref<128x128xf32, #tpu.memory_space<vmem>>, vector<128x128xf32>
    tpu.vector_store %arg2[%c0_6, %c0_7], %19 {strides = array<i32>} : memref<128x128xf32, #tpu.memory_space<vmem>>, vector<128x128xf32>,
    return
  }
  func.func @transform_0(%arg0: i32) -> (i32, i32) {
    %c0_i32 = arith.constant 0 : i32
    %c0_i32_0 = arith.constant 0 : i32
    return %arg0, %c0_i32 : i32, i32
  }
  func.func @transform_1(%arg0: i32) -> (i32, i32) {
    %c0_i32 = arith.constant 0 : i32
    %c0_i32_0 = arith.constant 0 : i32
    return %arg0, %c0_i32 : i32, i32
  }
}

</mosaic_0001>

<bundles_post_ra>
// kernel: clip_boxes.1
= control target key start
LH: loop header
LB: loop body
LE: loop exit
PB: predicated region body
PF: predicated region fallthrough
CT: control target
= control target key end

     0   :  { %s287_s6 = smov 0   ;;  %s376_s0 = inlined_call_operand.vmem [shape: f32[256,128], index: 0, kind: input, shape index: {}]   ;;  %s377_s1 = inlined_call_operand.vmem [shape: f32[256,128], index: 1, kind: output, shape index: {}]  }
   0x1 LB: > { %s246_s7 = sadd.s32 4294967295, %s273_s6   ;;  %p250_p0 = scmp.ge.s32.totalorder %s273_s6, 1  ;;  %s273_s6 = sphi %s287_s6, %s11_s6  }
   0x2   : > { %p88_p1 = scmp.lt.s32.totalorder %s273_s6, 3 }
   0x4   : > { %p89_p2 = pnand %p250_p0, %p88_p1 }
   0x5   : > { %s251_s8 = sshll.u32 (!%p89_p2), %s246_s7, 4  ;;  %v120_v0 = vlaneseq (!%p89_p2)  ;;  %v275_v3 = vmov (!%p89_p2), -inf   ;;  %v276_v5 = vmov (!%p89_p2), 16.0  }
   0x6   : > { %92 = sbr.rel (%p89_p2) target bundleno = 30 (0x1e), region = 24  ;;  %p109_p3 = scmp.lt.s32.totalorder (!%p89_p2), %s251_s8, 31 }
   0x7   : > { %v121_v1 = vand.u32 (!%p89_p2), 127, %v120_v0 }
   0x9   : > { %v122_v2 = vand.u32 (!%p89_p2), 3, %v121_v1 }
   0xb   : > { %vm123_vm0 = vcmp.lt.s32.totalorder (!%p89_p2), %v122_v2, 2 }
   0xc   : > { %v300_v4 = vsel (!%p89_p2), %vm123_vm0, 0.0, %v275_v3  ;;  %v302_v6 = vsel (!%p89_p2), %vm123_vm0, inf, %v276_v5 }
   0xd   : > { %s379_s8 = smov (!%p109_p3, %s251_s8), 31 }
   0xe   : > { %s252_s9 = sshll.u32 %s379_s8, 3 }
   0xf   : > { %s298_s12 = scalar_lea.vmem %s376_s0, %s252_s9  ;;  %s316_s15 = scalar_lea.vmem %s377_s1, %s252_s9 }
  0x10   : > { %v126_v7 = vld [vmem:[%s298_s12] sm:$0xff]  ;;  %v127_v8 = vld [vmem:[%s298_s12 + $0x8] sm:$0xff]  ;;  %v128_v9 = vld [vmem:[%s298_s12 + $0x10] sm:$0xff] }
  0x11   : > { %v142_v10 = vmax.f32 %v126_v7, %v300_v4  ;;  %v143_v11 = vmax.f32 %v127_v8, %v300_v4  ;;  %v144_v12 = vmax.f32 %v128_v9, %v300_v4  ;;  %v129_v13 = vld [vmem:[%s298_s12 + $0x18] sm:$0xff]  ;;  %v130_v14 = vld [vmem:[%s298_s12 + $0x20] sm:$0xff]  ;;  %v131_v15 = vld [vmem:[%s298_s12 + $0x28] sm:$0xff] }
  0x12   : > { %v145_v16 = vmax.f32 %v129_v13, %v300_v4  ;;  %v146_v17 = vmax.f32 %v130_v14, %v300_v4  ;;  %v147_v18 = vmax.f32 %v131_v15, %v300_v4  ;;  %v132_v19 = vld [vmem:[%s298_s12 + $0x30] sm:$0xff]  ;;  %v133_v20 = vld [vmem:[%s298_s12 + $0x38] sm:$0xff]  ;;  %v134_v21 = vld [vmem:[%s298_s12 + $0x40] sm:$0xff] }
  0x13   : > { %v158_v22 = vmin.f32 %v142_v10, %v302_v6  ;;  %v159_v23 = vmin.f32 %v143_v11, %v302_v6  ;;  %v160_v24 = vmin.f32 %v144_v12, %v302_v6  ;;  %v148_v25 = vmax.f32 %v132_v19, %v300_v4  ;;  %v135_v26 = vld [vmem:[%s298_s12 + $0x48] sm:$0xff]  ;;  %v136_v27 = vld [vmem:[%s298_s12 + $0x50] sm:$0xff]  ;;  %v137_v28 = vld [vmem:[%s298_s12 + $0x58] sm:$0xff] }
  0x14   : > { %v161_v29 = vmin.f32 %v145_v16, %v302_v6  ;;  %v162_v30 = vmin.f32 %v146_v17, %v302_v6  ;;  %v163_v31 = vmin.f32 %v147_v18, %v302_v6  ;;  %v149_v32 = vmax.f32 %v133_v20, %v300_v4  ;;  %v138_v33 = vld [vmem:[%s298_s12 + $0x60] sm:$0xff]  ;;  %v139_v34 = vld [vmem:[%s298_s12 + $0x68] sm:$0xff]  ;;  %v140_v35 = vld [vmem:[%s298_s12 + $0x70] sm:$0xff] }
  0x15   : > { %174 = vst [vmem:[%s316_s15] sm:$0xff] %v158_v22  ;;  %175 = vst [vmem:[%s316_s15 + $0x8] sm:$0xff] %v159_v23  ;;  %v164_v36 = vmin.f32 %v148_v25, %v302_v6  ;;  %v150_v37 = vmax.f32 %v134_v21, %v300_v4  ;;  %v151_v38 = vmax.f32 %v135_v26, %v300_v4  ;;  %v141_v40 = vld [vmem:[%s298_s12 + $0x78] sm:$0xff] }
  0x16   : > { %176 = vst [vmem:[%s316_s15 + $0x10] sm:$0xff] %v160_v24  ;;  %v152_v39 = vmax.f32 %v136_v27, %v300_v4  ;;  %177 = vst [vmem:[%s316_s15 + $0x18] sm:$0xff] %v161_v29  ;;  %v165_v41 = vmin.f32 %v149_v32, %v302_v6  ;;  %v153_v42 = vmax.f32 %v137_v28, %v300_v4 }
  0x17   : > { %178 = vst [vmem:[%s316_s15 + $0x20] sm:$0xff] %v162_v30  ;;  %179 = vst [vmem:[%s316_s15 + $0x28] sm:$0xff] %v163_v31  ;;  %v154_v43 = vmax.f32 %v138_v33, %v300_v4  ;;  %v155_v44 = vmax.f32 %v139_v34, %v300_v4  ;;  %v166_v45 = vmin.f32 %v150_v37, %v302_v6 }
  0x18   : > { %180 = vst [vmem:[%s316_s15 + $0x30] sm:$0xff] %v164_v36  ;;  %v167_v46 = vmin.f32 %v151_v38, %v302_v6  ;;  %v168_v47 = vmin.f32 %v152_v39, %v302_v6  ;;  %v156_v48 = vmax.f32 %v140_v35, %v300_v4  ;;  %181 = vst [vmem:[%s316_s15 + $0x38] sm:$0xff] %v165_v41 }
  0x19   : > { %v169_v49 = vmin.f32 %v153_v42, %v302_v6  ;;  %v170_v50 = vmin.f32 %v154_v43, %v302_v6  ;;  %v171_v51 = vmin.f32 %v155_v44, %v302_v6  ;;  %v157_v52 = vmax.f32 %v141_v40, %v300_v4  ;;  %182 = vst [vmem:[%s316_s15 + $0x40] sm:$0xff] %v166_v45 }
  0x1a   : > { %183 = vst [vmem:[%s316_s15 + $0x48] sm:$0xff] %v167_v46  ;;  %184 = vst [vmem:[%s316_s15 + $0x50] sm:$0xff] %v168_v47  ;;  %v172_v53 = vmin.f32 %v156_v48, %v302_v6 }
  0x1b   : > { %185 = vst [vmem:[%s316_s15 + $0x58] sm:$0xff] %v169_v49  ;;  %186 = vst [vmem:[%s316_s15 + $0x60] sm:$0xff] %v170_v50  ;;  %v173_v54 = vmin.f32 %v157_v52, %v302_v6 }
  0x1c   : > { %187 = vst [vmem:[%s316_s15 + $0x68] sm:$0xff] %v171_v51  ;;  %188 = vst [vmem:[%s316_s15 + $0x70] sm:$0xff] %v172_v53 }
  0x1d   : > { %189 = vst [vmem:[%s316_s15 + $0x78] sm:$0xff] %v173_v54 }
  0x1e PF: > { %s11_s6 = sadd.s32 1, %s273_s6  }
  0x1f   : > { %p8_p4 = scmp.ge.s32.totalorder %s11_s6, 4  }
  0x21   :  { %10 = sbr.rel (!%p8_p4) target bundleno = 1 (0x1), region = 54 }

</bundles_post_ra>
